<compile_context>
chip_gen: v7x
topology: tpu7x:2x2x1
jax: 0.10.0
libtpu: 0.0.40
codegen_flags: <defaults>
</compile_context>

<pallas_src>
import numpy as np
import jax
import jax.numpy as jnp
from jax.experimental import pallas as pl
from jax.experimental.pallas import tpu as pltpu

# periods buffer from the module __init__: [0.25, 0.5, 1.0, 2.0] (years)
PERIODS = (0.25, 0.5, 1.0, 2.0)
N_BASIS = 2 + 2 * len(PERIODS)      # 1, t, (sin, cos) x 4  -> 10
N_BASIS_PAD = 16                    # pad K so the (S,16)x(16,T) tiles are layout-friendly


def _round_up(x, m):
    return ((x + m - 1) // m) * m


def _insar_matmul_kernel(coef_ref, basis_ref, out_ref):
    """out[s, t] = sum_k coef[s, k] * basis[k, t]  -- single MXU matmul per tile."""
    out_ref[...] = jnp.dot(coef_ref[...], basis_ref[...],
                           preferred_element_type=jnp.float32)


def insar_forward(time_vector, constant_offset, linear_trend,
                  seasonal_amplitudes, seasonal_phases,
                  *, station_tile=512, time_tile=2048):
    """
    time_vector:          (T,)   float32
    constant_offset:      (S,)   float32   (nn.Parameter)
    linear_trend:         (S,)   float32   (ps00_rates buffer)
    seasonal_amplitudes:  (S, 4) float32
    seasonal_phases:      (S, 4) float32
    returns signals:      (S, T) float32
    """
    S = constant_offset.shape[0]
    T = time_vector.shape[0]
    f32 = jnp.float32

    # ---- tile sizes: (8,128)-aligned, capped at the problem size ------------
    TS = min(station_tile, _round_up(S, 8))
    TT = min(time_tile, _round_up(T, 128))

    t = time_vector.astype(f32)
    offset = constant_offset.astype(f32)
    trend = linear_trend.astype(f32)
    amps = seasonal_amplitudes.astype(f32)
    phases = seasonal_phases.astype(f32)

    # ---- time basis B: (16, T), O(T) transcendentals -------------------------
    rows = [jnp.ones_like(t), t]
    for period in PERIODS:
        w = f32(2.0 * np.pi / period)
        rows.append(jnp.sin(w * t))
        rows.append(jnp.cos(w * t))
    basis = jnp.stack(rows, axis=0)                                  # (10, T)
    basis = jnp.pad(basis, ((0, N_BASIS_PAD - N_BASIS), (0, 0)))     # (16, T)

    # ---- per-station coefficients C: (S, 16), O(S) transcendentals -----------
    cols = [offset, trend]
    for i in range(len(PERIODS)):
        cols.append(amps[:, i] * jnp.cos(phases[:, i]))
        cols.append(amps[:, i] * jnp.sin(phases[:, i]))
    coef = jnp.stack(cols, axis=1)                                   # (S, 10)
    coef = jnp.pad(coef, ((0, 0), (0, N_BASIS_PAD - N_BASIS)))       # (S, 16)

    # grid: time tiles outer, station tiles inner (fast) -> the shared basis
    # tile is fetched once per time tile; only the tiny coef tile moves per step.
    grid = (pl.cdiv(T, TT), pl.cdiv(S, TS))

    cost = pl.CostEstimate(
        flops=2 * N_BASIS_PAD * S * T,
        transcendentals=0,
        bytes_accessed=4 * (S * T + N_BASIS_PAD * (S + T)),
    )

    out = pl.pallas_call(
        _insar_matmul_kernel,
        out_shape=jax.ShapeDtypeStruct((S, T), jnp.float32),
        grid=grid,
        in_specs=[
            # packed per-station coefficients: changes with the inner grid axis
            pl.BlockSpec((TS, N_BASIS_PAD), lambda jt, si: (si, 0)),
            # shared time basis: constant across the inner grid axis
            pl.BlockSpec((N_BASIS_PAD, TT), lambda jt, si: (0, jt)),
        ],
        out_specs=pl.BlockSpec((TS, TT), lambda jt, si: (si, jt)),
        compiler_params=pltpu.CompilerParams(
            dimension_semantics=("parallel", "parallel"),
        ),
        cost_estimate=cost,
    )(coef, basis)

    return out


def insar_reference(time_vector, constant_offset, linear_trend,
                    seasonal_amplitudes, seasonal_phases):
    """Pure-JAX reference mirroring the PyTorch forward pass exactly."""
    t = time_vector[None, :]                                    # (1, T)
    signals = constant_offset[:, None] + linear_trend[:, None] * t
    for i, period in enumerate(PERIODS):
        amp = seasonal_amplitudes[:, i][:, None]
        ph = seasonal_phases[:, i][:, None]
        freq = 1.0 / period
        signals = signals + amp * jnp.sin(2 * np.pi * freq * t + ph)
    return signals


if __name__ == "__main__":
    # Small, deterministic problem (exercises the ragged-edge path: 20 stations,
    # 100 timepoints -> tiles of 24 x 128, output written directly at (20, 100)).
    n_stations = 20
    n_timepoints = 100

    key = jax.random.PRNGKey(0)
    k_rates, k_phases = jax.random.split(key, 2)

    # --- parameter init mirroring the module __init__ ---
    constant_offset = jnp.zeros((n_stations,), dtype=jnp.float32)
    linear_trend = jax.random.normal(k_rates, (n_stations,), dtype=jnp.float32) * 10.0
    seasonal_amplitudes = jnp.ones((n_stations, 4), dtype=jnp.float32) * 3.0
    seasonal_phases = jax.random.uniform(
        k_phases, (n_stations, 4), dtype=jnp.float32) * (2.0 * np.pi)

    # time vector in years (like InSAR acquisition times)
    time_vector = jnp.linspace(0.0, 2.0, n_timepoints, dtype=jnp.float32)

    out = insar_forward(time_vector, constant_offset, linear_trend,
                        seasonal_amplitudes, seasonal_phases)
    out = jax.block_until_ready(out)

    ref = insar_reference(time_vector, constant_offset, linear_trend,
                          seasonal_amplitudes, seasonal_phases)
    # MXU f32 matmul (bf16x3 passes) rounds slightly differently from the
    # direct VPU chain; 1e-4 tolerance is comfortably within that budget.
    np.testing.assert_allclose(np.asarray(out), np.asarray(ref),
                               rtol=1e-4, atol=1e-4)

    assert out.shape == (n_stations, n_timepoints)
    print("KERNEL_OK")
</pallas_src>

<mosaic_0001>
module attributes {stable_mosaic.version = 11 : i64} {
  func.func @_insar_matmul_kernel(%arg0: i32, %arg1: i32, %arg2: memref<24x16xf32, #tpu.memory_space<vmem>>, %arg3: memref<16x128xf32, #tpu.memory_space<vmem>>, %arg4: memref<24x128xf32, #tpu.memory_space<vmem>>) attributes {dimension_semantics = [#tpu.dimension_semantics<parallel>, #tpu.dimension_semantics<parallel>], iteration_bounds = array<i64: 1, 1>, scalar_prefetch = 0 : i64, scratch_operands = 0 : i64, tpu.core_type = #tpu.core_type<tc>, window_params = [{transform_indices = @transform_0, window_bounds = array<i64: 24, 16>}, {transform_indices = @transform_1, window_bounds = array<i64: 16, 128>}, {transform_indices = @transform_2, window_bounds = array<i64: 24, 128>}]} {
    %c0 = arith.constant 0 : index
    %c0_0 = arith.constant 0 : index
    %0 = vector.load %arg2[%c0, %c0_0] : memref<24x16xf32, #tpu.memory_space<vmem>>, vector<24x16xf32>
    %c0_1 = arith.constant 0 : index
    %c0_2 = arith.constant 0 : index
    %1 = vector.load %arg3[%c0_1, %c0_2] : memref<16x128xf32, #tpu.memory_space<vmem>>, vector<16x128xf32>
    %cst = arith.constant dense<0.000000e+00> : vector<24x128xf32>
    %2 = tpu.matmul %0, %1, %cst {dimension_numbers = #tpu.dot_dimension_numbers<[1], [0], [0], [1], [0, 0, 1, 1], [], []>} : vector<24x16xf32>, vector<16x128xf32>, vector<24x128xf32> -> vector<24x128xf32>
    %c0_3 = arith.constant 0 : index
    %c0_4 = arith.constant 0 : index
    %3 = vector.load %arg4[%c0_3, %c0_4] : memref<24x128xf32, #tpu.memory_space<vmem>>, vector<24x128xf32>
    tpu.vector_store %arg4[%c0_3, %c0_4], %2 {strides = array<i32>} : memref<24x128xf32, #tpu.memory_space<vmem>>, vector<24x128xf32>,
    return
  }
  func.func @transform_0(%arg0: i32, %arg1: i32) -> (i32, i32) {
    %c0_i32 = arith.constant 0 : i32
    %c0_i32_0 = arith.constant 0 : i32
    return %arg1, %c0_i32 : i32, i32
  }
  func.func @transform_1(%arg0: i32, %arg1: i32) -> (i32, i32) {
    %c0_i32 = arith.constant 0 : i32
    %c0_i32_0 = arith.constant 0 : i32
    return %c0_i32, %arg0 : i32, i32
  }
  func.func @transform_2(%arg0: i32, %arg1: i32) -> (i32, i32) {
    %c0_i32 = arith.constant 0 : i32
    return %arg1, %arg0 : i32, i32
  }
}

</mosaic_0001>

<bundles_post_ra>
// kernel: tpu_custom_call.1
= control target key start
LH: loop header
LB: loop body
LE: loop exit
PB: predicated region body
PF: predicated region fallthrough
CT: control target
= control target key end

     0   :  { %v182_v2 = vmov 0.0|0.0   ;;  %s230_s0 = inlined_call_operand.vmem [shape: f32[20,16], index: 0, kind: input, shape index: {}]   ;;  %s231_s1 = inlined_call_operand.vmem [shape: f32[16,100], index: 1, kind: input, shape index: {}]   ;;  %s232_s2 = inlined_call_operand.hbm [shape: f32[20,100], index: 2, kind: output, shape index: {}]  }
   0x1   :  { %v15_v0 = vld [vmem:[%s231_s1] sm:$0xff]  ;;  %v16_v1 = vld [vmem:[%s231_s1 + $0x8] sm:$0xff]  ;;  %150 = vmatprep.subr.bf16.mxu1 %v182_v2  ;;  %147 = vmatprep.subr.bf16.mxu0 %v182_v2 }
   0x2   :  { %v148_v3 = vpack.c.bf16 %v16_v1, %v15_v0 }
   0x3   :  { %7 = vsyncpa [#allocation3], 0  ;;  %vm183_vm0 = vmmov 0   ;;  %v184_v4 = vmov 0.0   ;;  %v13_v5 = vld [vmem:[%s230_s0 + $0x8] sm:$0xff]  ;;  %vm17_vm1 = vcmask 130048  }
   0x4   :  { %141 = vmatprep.mubr.msk.f32.mxu1 %vm183_vm0, %v184_v4  ;;  %138 = vmatprep.mubr.msk.f32.mxu0 %vm183_vm0, %v184_v4  ;;  %v12_v6 = vld [vmem:[%s230_s0] sm:$0xff]  ;;  %v14_v7 = vld [vmem:[%s230_s0 + $0x10] sm:$0xff]  ;;  %s185_s18 = smov [#allocation2]  }
   0x5   :  { %151 = vmatpush3.bf16.msra.mxu1 %v148_v3  ;;  %149 = vmatpush3.bf16.msra.mxu0 %v148_v3  ;;  %s115_s19 = sshll.u32 %s185_s18, 4  ;;  %s116_s19 = int_to_ptr.vmem [resolvable:$true] %s115_s19 }
   0x6   :  { %s158_s20 = scalar_lea.vmem %s116_s19, 384  ;;  %p163_p1 = scmp.lt.s32.totalorder %s116_s19, %s116_s19 }
   0x7   :  { %p159_p0 = scmp.ne.s32.totalorder %s116_s19, %s158_s20  ;;  %p164_p2 = scmp.lt.s32.totalorder %s158_s20, %s158_s20 }
   0x8   :  { %142 = vmatmul.mubr.msk.f32.vlgmr.msra.gmra.mrb[0].mxu1 %vm17_vm1, %v13_v5  ;;  %139 = vmatmul.mubr.msk.f32.vlgmr.msra.gmra.mrb[0].mxu0 %vm17_vm1, %v12_v6 }
   0x9   :  { %144 = vmatprep.mubr.msk.f32.mxu1 %vm183_vm0, %v184_v4  ;;  %p165_p3 = por %p164_p2, %p163_p1 }
   0xb   :  { %p166_p4 = pnand %p165_p3, %p159_p0 }
   0xc   :  { %145 = vmatmul.mubr.msk.f32.gmra.mrb[2].mxu1 %vm17_vm1, %v14_v7 }
  0xdb   :  { %v98_v8 = vpop.f32.mrb[0].mxu1  ;;  %v93_v9 = vpop.f32.mrb[0].mxu0 }
  0xdc   :  { %108 = vst [vmem:[#allocation2 + $0x8] sm:$0xff] %v98_v8  ;;  %v143_v10 = vpop.f32.mrb[1].mxu1  ;;  %107 = vst [vmem:[#allocation2] sm:$0xff] %v93_v9  ;;  %v140_v11 = vpop.f32.mrb[1].mxu0 }
  0xdf   :  { %v103_v12 = vpop.f32.mrb[2].mxu1 }
  0xe0   :  { %109 = vst [vmem:[#allocation2 + $0x10] sm:$0xff] %v103_v12  ;;  %v146_v13 = vpop.f32.mrb[3].mxu1 }
  0xe1   :  { %169 = shalt.err (!%p166_p4)
}
  0xe2   :  { %s170_s22 = scalar_lea.hbm %s232_s2, 384 }
  0xe3   :  { %p171_p5 = scmp.ne.s32.totalorder %s232_s2, %s170_s22  ;;  %p174_p6 = scmp.lt.u32.totalorder %s170_s22, %s232_s2 }
  0xe5   :  { %p176_p7 = pnand %p174_p6, %p171_p5 }
  0xe7   :  { %179 = shalt.err (!%p176_p7)
}
  0xe8   :  { %s186_s27 = smov 128   ;;  %s187_s28 = smov 8  }
  0xe9   :  { %121 = dma.vmem_to_hbm [thread:$0]  %s116_s19, 384, %s232_s2, [#allocation3], %s186_s27, %s186_s27, %s187_s28  }
  0xea   :  { %180 = dma.done.wait [#allocation3], 384  }
  0xeb   :  { %181 = vsyncadd [#allocation3], 4294966912 }
  0xec   :  { %125 = vsyncpa [#allocation3], 1 }

</bundles_post_ra>
